<compile_context>
chip_gen: v6e
topology: v6e:2x2x1
jax: 0.10.0
libtpu: 0.0.40
codegen_flags: <defaults>
</compile_context>

<pallas_src>
import numpy as np
import jax
import jax.numpy as jnp
from jax.experimental import pallas as pl
from jax.experimental.pallas import tpu as pltpu

HIDDEN = 32          # synthetic ESM hidden dim
CPR = 9              # coord features per residue (3 backbone atoms x xyz)


def _round_up(x, m):
    return (x + m - 1) // m * m


def _cdiv(a, b):
    return -(-a // b)


def _tpu_tuning():
    """Return (pack, epilogue_dtype) for the local TPU generation.

    v6e / v7x: 256-wide MXU + bf16 VPU/EUP -> pack 8 residues per kernel row
    (HP = 256) and run the GELU/bias epilogue in bf16.
    v5e and older (or unknown): 128-wide MXU, no bf16 VPU/EUP -> pack 4
    residues per row (HP = 128) and keep the elementwise epilogue in f32.
    Both paths are functionally identical.
    """
    try:
        kind = jax.devices()[0].device_kind.lower()
    except Exception:
        kind = ""
    if ("v6" in kind) or ("v7" in kind) or ("7x" in kind):
        return 8, jnp.bfloat16
    return 4, jnp.float32


# ----------------------------------------------------------------------------
# Pallas kernel: one row-tile of the synthetic ESM trunk (PACK residues / row)
# ----------------------------------------------------------------------------
def _make_encoder_kernel(epi_dtype):
    def _encoder_kernel(cp_ref, a_ref, b_ref, wc_ref, wp_ref, w2_ref, b2_ref,
                        out_ref):
        # cp_ref : (TM, P*9)   bf16  packed backbone coords (P residues / row)
        # a_ref  : (P*9, P*3)  bf16  xyz->atom summing matrix   (grouped AND)
        # b_ref  : (P*3, P)    bf16  atom->residue summing matrix (grouped ANY)
        # wc_ref : (P*9, P*H)  bf16  block-diagonal coord projection
        # wp_ref : (P,   P*H)  bf16  block-diagonal plddt projection
        # w2_ref : (P*H, P*H)  bf16  block-diagonal hidden->hidden
        # b2_ref : (1,   P*H)  epi   packed output bias
        # out_ref: (TM,  P*H)  bf16  packed embeddings (lane-dense store)
        c32 = cp_ref[...].astype(jnp.float32)
        # isfinite(x) == (x == x) & (|x| != inf); coords are already
        # bf16-rounded, matching the reference's coords.to(torch.bfloat16).
        finite = jnp.logical_and(c32 == c32, jnp.abs(c32) != jnp.inf)
        c_clean = jnp.where(finite, c32, 0.0).astype(jnp.bfloat16)
        fin_bf = finite.astype(jnp.bfloat16)

        # per_res_plddt = coords.isfinite().all(xyz).any(atoms):
        # two tiny summing matmuls (counts 0..3 exact in bf16, accum in f32).
        atom_cnt = jnp.dot(fin_bf, a_ref[...],
                           preferred_element_type=jnp.float32)      # (TM, P*3)
        atom_ok = (atom_cnt > 2.5).astype(jnp.bfloat16)             # AND xyz
        res_cnt = jnp.dot(atom_ok, b_ref[...],
                          preferred_element_type=jnp.float32)       # (TM, P)
        plddt = (res_cnt > 0.5).astype(jnp.bfloat16)                # ANY atoms

        # synthetic bf16 "autocast" trunk with f32 MXU accumulation.
        h = jnp.dot(c_clean, wc_ref[...], preferred_element_type=jnp.float32)
        h = h + jnp.dot(plddt, wp_ref[...], preferred_element_type=jnp.float32)
        # TODO(synk): reference PyTorch nn.GELU default is the exact erf form.
        h = jax.nn.gelu(h.astype(epi_dtype), approximate=True)
        e = jnp.dot(h.astype(jnp.bfloat16), w2_ref[...],
                    preferred_element_type=jnp.float32)             # (TM, P*H)
        out_ref[...] = (e.astype(epi_dtype) + b2_ref[...]).astype(jnp.bfloat16)

    return _encoder_kernel


def _encode_rows_pallas(packed_coords, params, tile_packed, epi_dtype):
    """packed_coords: (RP, P*9) bf16 -> (RP, P*HIDDEN) bf16."""
    rp, kdim = packed_coords.shape
    a_m, b_m, wc_p, wp_p, w2_p, b2_p = params
    hp = wc_p.shape[1]
    return pl.pallas_call(
        _make_encoder_kernel(epi_dtype),
        out_shape=jax.ShapeDtypeStruct((rp, hp), jnp.bfloat16),
        grid=(rp // tile_packed,),
        in_specs=[
            pl.BlockSpec((tile_packed, kdim), lambda i: (i, 0)),
            pl.BlockSpec(a_m.shape, lambda i: (0, 0)),    # weights stay
            pl.BlockSpec(b_m.shape, lambda i: (0, 0)),    # VMEM-resident
            pl.BlockSpec(wc_p.shape, lambda i: (0, 0)),
            pl.BlockSpec(wp_p.shape, lambda i: (0, 0)),
            pl.BlockSpec(w2_p.shape, lambda i: (0, 0)),
            pl.BlockSpec(b2_p.shape, lambda i: (0, 0)),
        ],
        out_specs=pl.BlockSpec((tile_packed, hp), lambda i: (i, 0)),
        compiler_params=pltpu.CompilerParams(
            dimension_semantics=("parallel",),    # shard row-tiles over v7x TCs
            vmem_limit_bytes=32 * 1024 * 1024),
    )(packed_coords, a_m, b_m, wc_p, wp_p, w2_p, b2_p)


# ----------------------------------------------------------------------------
# ProteinEncoder wrapper (windowing / overlap merge / batching) — fully jitted
# ----------------------------------------------------------------------------
class ProteinEncoderPallas:
    def __init__(self, window_size=8, window_overlap=4, key=None):
        assert 0 <= window_overlap < window_size
        self.max_seq_len = window_size
        self.window_overlap = window_overlap
        self.pack, self.epi_dtype = _tpu_tuning()
        P, H = self.pack, HIDDEN

        if key is None:
            key = jax.random.PRNGKey(0)
        k1, k2, k3, k4 = jax.random.split(key, 4)
        # TODO(synk): ESM3.from_pretrained() weights replaced by a deterministic
        # synthetic bf16 MLP trunk with matching I/O semantics.
        wc = np.asarray(jax.random.normal(k1, (CPR, H), jnp.float32)) * 0.1
        wp = np.asarray(jax.random.normal(k2, (1, H), jnp.float32)) * 0.1
        w2 = np.asarray(jax.random.normal(k3, (H, H), jnp.float32)) * 0.1
        b2 = np.asarray(jax.random.normal(k4, (1, H), jnp.float32)) * 0.02

        # Block-diagonal packing: P residues per kernel row -> lane-dense output.
        wc_p = np.zeros((P * CPR, P * H), np.float32)
        wp_p = np.zeros((P, P * H), np.float32)
        w2_p = np.zeros((P * H, P * H), np.float32)
        for j in range(P):
            wc_p[j * CPR:(j + 1) * CPR, j * H:(j + 1) * H] = wc
            wp_p[j, j * H:(j + 1) * H] = wp[0]
            w2_p[j * H:(j + 1) * H, j * H:(j + 1) * H] = w2
        b2_p = np.tile(b2, (1, P))

        # Grouped-reduction helpers for per_res_plddt (AND over xyz, ANY atoms).
        a_m = np.zeros((P * CPR, P * 3), np.float32)
        a_m[np.arange(P * CPR), np.arange(P * CPR) // 3] = 1.0
        b_m = np.zeros((P * 3, P), np.float32)
        b_m[np.arange(P * 3), np.arange(P * 3) // 3] = 1.0

        self.params = (
            jnp.asarray(a_m, jnp.bfloat16),
            jnp.asarray(b_m, jnp.bfloat16),
            jnp.asarray(wc_p, jnp.bfloat16),
            jnp.asarray(wp_p, jnp.bfloat16),
            jnp.asarray(w2_p, jnp.bfloat16),
            jnp.asarray(b2_p, self.epi_dtype),
        )
        # Whole forward jitted: window layout / gather / taper / merge factors
        # are static per (B, N), so the kernel launches exactly once per call.
        self._forward = jax.jit(self._forward_impl)

    # ---- sliding window indices (pure python, matches reference) ----
    def _get_windows(self, num_residues):
        windows = []
        start = 0
        while start < num_residues:
            end = min(start + self.max_seq_len, num_residues)
            windows.append((start, end))
            if end == num_residues:
                break
            start = end - self.window_overlap
        return windows

    # ---- static taper weights + per-residue weight sum (reference math) ----
    def _window_taper(self, windows, n_res, width):
        nw = len(windows)
        taper = np.zeros((nw, width), np.float32)
        for w, (st, en) in enumerate(windows):
            L = en - st
            m = np.ones((L,), np.float32)
            if st > 0:
                r = min(self.window_overlap, L)
                m[:r] = np.linspace(0.0, 1.0, r, dtype=np.float32)
            if en < n_res:
                r = min(self.window_overlap, L)
                m[L - r:] = np.linspace(1.0, 0.0, r, dtype=np.float32)
            taper[w, :L] = m
        wsum = np.zeros((n_res,), np.float32)
        for w, (st, en) in enumerate(windows):
            wsum[st:en] += taper[w, :en - st]
        return taper, wsum

    # ---- jitted forward: gather all windows -> one Pallas call -> O(N) merge ----
    def _forward_impl(self, coords):
        P, H, wsz = self.pack, HIDDEN, self.max_seq_len
        bsz, n_res = coords.shape[:2]

        windows = [(0, n_res)] if n_res <= wsz else self._get_windows(n_res)
        nw = len(windows)
        width = n_res if n_res <= wsz else wsz      # rows per window in stream

        # Static row layout: (batch, window, position) -> residue index; short
        # windows pad with their first residue (zero taper -> no contribution).
        row_idx = np.zeros((nw, width), np.int32)
        for w, (st, en) in enumerate(windows):
            L = en - st
            row_idx[w, :L] = np.arange(st, en, dtype=np.int32)
            row_idx[w, L:] = st
        gather = (np.arange(bsz, dtype=np.int32)[:, None, None] * n_res
                  + row_idx[None]).reshape(-1)
        r0 = gather.size

        # Row tile: up to 8192 residues per grid step, targeting ~4 grid steps
        # so the "parallel" grid axis keeps both v7x TensorCores busy.
        rp0 = _cdiv(r0, P)
        tile_packed = min(max(16, 8192 // P), _round_up(_cdiv(rp0, 4), 16))
        rp_pad = _round_up(rp0, tile_packed)
        gather_full = np.zeros((rp_pad * P,), np.int32)
        gather_full[:r0] = gather

        # coords -> bf16 FIRST (reference does coords.to(torch.bfloat16)); the
        # window gather and the kernel's coord reads then move half the bytes.
        coords_bf = coords.reshape(bsz * n_res, CPR).astype(jnp.bfloat16)
        rows = jnp.take(coords_bf, jnp.asarray(gather_full), axis=0)
        packed = rows.reshape(rp_pad, P * CPR)

        # Single Pallas launch over all windows of all batch items (bf16 out).
        emb_packed = _encode_rows_pallas(packed, self.params, tile_packed,
                                         self.epi_dtype)
        emb = emb_packed.reshape(rp_pad * P, H)[:r0]
        emb = emb.reshape(bsz, nw, width, H)

        if n_res <= wsz:
            # single window per batch item: direct output (no merge), as reference
            return emb[:, 0, :n_res, :].astype(jnp.float32)

        # O(N) banded overlap merge: window starts are exactly w*stride, so the
        # j-th stride-chunk of window w lands at output chunk (w + j).  Upcast
        # to f32, apply the static taper, do J shifted adds and scale by the
        # static 1/(weight_sum + 1e-8) — exactly the reference scatter-add.
        taper, wsum = self._window_taper(windows, n_res, wsz)
        stride = wsz - self.window_overlap
        J = _cdiv(wsz, stride)
        weighted = emb.astype(jnp.float32) * jnp.asarray(taper)[None, :, :, None]
        acc = jnp.zeros((bsz, nw + J - 1, stride, H), jnp.float32)
        for j in range(J):
            lo = j * stride
            cl = min(stride, wsz - lo)
            acc = acc.at[:, j:j + nw, :cl, :].add(weighted[:, :, lo:lo + cl, :])
        merged = acc.reshape(bsz, (nw + J - 1) * stride, H)[:, :n_res, :]
        inv_wsum = jnp.asarray(1.0 / (wsum + 1e-8), jnp.float32)
        return merged * inv_wsum[None, :, None]

    # ---- public forward ----
    def __call__(self, protein_data):
        coords = protein_data['coords']                    # (B, N, 3, 3)
        residue_indices = protein_data['residue_indices']  # (B, N)
        embeddings = self._forward(coords)                 # (B, N, HIDDEN) f32
        return {'embeddings': embeddings, 'residue_indices': residue_indices}


if __name__ == "__main__":
    key = jax.random.PRNGKey(0)
    k_coords, k_params = jax.random.split(key)

    B, N = 2, 16
    coords = jax.random.normal(k_coords, (B, N, 3, 3), jnp.float32)
    # inject non-finite coords to exercise the per_res_plddt path
    coords = coords.at[0, 3].set(jnp.nan)     # whole residue missing -> plddt 0
    coords = coords.at[1, 5, 1].set(jnp.inf)  # one atom missing -> plddt still 1
    residue_indices = jnp.tile(jnp.arange(N, dtype=jnp.int32)[None, :], (B, 1))

    encoder = ProteinEncoderPallas(window_size=8, window_overlap=4, key=k_params)
    out = encoder({'coords': coords, 'residue_indices': residue_indices})

    emb = jax.block_until_ready(out['embeddings'])
    assert emb.shape == (B, N, HIDDEN), emb.shape
    assert emb.dtype == jnp.float32
    assert bool(jnp.all(jnp.isfinite(emb)))
    assert out['residue_indices'].shape == (B, N)
    print("KERNEL_OK")
</pallas_src>

<mosaic_0001>
module attributes {stable_mosaic.version = 11 : i64} {
  func.func @_encoder_kernel(%arg0: i32, %arg1: memref<16x36xbf16, #tpu.memory_space<vmem>>, %arg2: memref<36x12xbf16, #tpu.memory_space<vmem>>, %arg3: memref<12x4xbf16, #tpu.memory_space<vmem>>, %arg4: memref<36x128xbf16, #tpu.memory_space<vmem>>, %arg5: memref<4x128xbf16, #tpu.memory_space<vmem>>, %arg6: memref<128x128xbf16, #tpu.memory_space<vmem>>, %arg7: memref<1x128xf32, #tpu.memory_space<vmem>>, %arg8: memref<16x128xbf16, #tpu.memory_space<vmem>>) attributes {dimension_semantics = [#tpu.dimension_semantics<parallel>], iteration_bounds = array<i64: 1>, scalar_prefetch = 0 : i64, scratch_operands = 0 : i64, tpu.core_type = #tpu.core_type<tc>, window_params = [{transform_indices = @transform_0, window_bounds = array<i64: 16, 36>}, {pipeline_mode = #tpu.pipeline_mode<synchronous>, transform_indices = @transform_1, window_bounds = array<i64: 36, 12>}, {pipeline_mode = #tpu.pipeline_mode<synchronous>, transform_indices = @transform_2, window_bounds = array<i64: 12, 4>}, {pipeline_mode = #tpu.pipeline_mode<synchronous>, transform_indices = @transform_3, window_bounds = array<i64: 36, 128>}, {pipeline_mode = #tpu.pipeline_mode<synchronous>, transform_indices = @transform_4, window_bounds = array<i64: 4, 128>}, {pipeline_mode = #tpu.pipeline_mode<synchronous>, transform_indices = @transform_5, window_bounds = array<i64: 128, 128>}, {pipeline_mode = #tpu.pipeline_mode<synchronous>, transform_indices = @transform_6, window_bounds = array<i64: 1, 128>}, {transform_indices = @transform_7, window_bounds = array<i64: 16, 128>}]} {
    %c0 = arith.constant 0 : index
    %c0_0 = arith.constant 0 : index
    %0 = vector.load %arg1[%c0, %c0_0] : memref<16x36xbf16, #tpu.memory_space<vmem>>, vector<16x36xbf16>
    %1 = arith.extf %0 : vector<16x36xbf16> to vector<16x36xf32>
    %2 = arith.cmpf oeq, %1, %1 : vector<16x36xf32>
    %3 = math.absf %1 : vector<16x36xf32>
    %cst = arith.constant 0x7F800000 : f32
    %4 = vector.broadcast %cst : f32 to vector<16x36xf32>
    %5 = arith.cmpf one, %3, %4 : vector<16x36xf32>
    %6 = arith.andi %2, %5 : vector<16x36xi1>
    %cst_1 = arith.constant 0.000000e+00 : f32
    %7 = vector.broadcast %cst_1 : f32 to vector<16x36xf32>
    %8 = arith.select %6, %1, %7 : vector<16x36xi1>, vector<16x36xf32>
    %9 = arith.truncf %8 : vector<16x36xf32> to vector<16x36xbf16>
    %10 = arith.extui %6 : vector<16x36xi1> to vector<16x36xi32>
    %11 = arith.sitofp %10 : vector<16x36xi32> to vector<16x36xf32>
    %12 = arith.truncf %11 : vector<16x36xf32> to vector<16x36xbf16>
    %c0_2 = arith.constant 0 : index
    %c0_3 = arith.constant 0 : index
    %13 = vector.load %arg2[%c0_2, %c0_3] : memref<36x12xbf16, #tpu.memory_space<vmem>>, vector<36x12xbf16>
    %cst_4 = arith.constant dense<0.000000e+00> : vector<16x12xf32>
    %14 = tpu.matmul %12, %13, %cst_4 {dimension_numbers = #tpu.dot_dimension_numbers<[1], [0], [0], [1], [0, 0, 1, 1], [], []>} : vector<16x36xbf16>, vector<36x12xbf16>, vector<16x12xf32> -> vector<16x12xf32>
    %cst_5 = arith.constant 2.500000e+00 : f32
    %15 = vector.broadcast %cst_5 : f32 to vector<16x12xf32>
    %16 = arith.cmpf ogt, %14, %15 : vector<16x12xf32>
    %17 = arith.extui %16 : vector<16x12xi1> to vector<16x12xi32>
    %18 = arith.sitofp %17 : vector<16x12xi32> to vector<16x12xf32>
    %19 = arith.truncf %18 : vector<16x12xf32> to vector<16x12xbf16>
    %c0_6 = arith.constant 0 : index
    %c0_7 = arith.constant 0 : index
    %20 = vector.load %arg3[%c0_6, %c0_7] : memref<12x4xbf16, #tpu.memory_space<vmem>>, vector<12x4xbf16>
    %cst_8 = arith.constant dense<0.000000e+00> : vector<16x4xf32>
    %21 = tpu.matmul %19, %20, %cst_8 {dimension_numbers = #tpu.dot_dimension_numbers<[1], [0], [0], [1], [0, 0, 1, 1], [], []>} : vector<16x12xbf16>, vector<12x4xbf16>, vector<16x4xf32> -> vector<16x4xf32>
    %cst_9 = arith.constant 5.000000e-01 : f32
    %22 = vector.broadcast %cst_9 : f32 to vector<16x4xf32>
    %23 = arith.cmpf ogt, %21, %22 : vector<16x4xf32>
    %24 = arith.extui %23 : vector<16x4xi1> to vector<16x4xi32>
    %25 = arith.sitofp %24 : vector<16x4xi32> to vector<16x4xf32>
    %26 = arith.truncf %25 : vector<16x4xf32> to vector<16x4xbf16>
    %c0_10 = arith.constant 0 : index
    %c0_11 = arith.constant 0 : index
    %27 = vector.load %arg4[%c0_10, %c0_11] : memref<36x128xbf16, #tpu.memory_space<vmem>>, vector<36x128xbf16>
    %cst_12 = arith.constant dense<0.000000e+00> : vector<16x128xf32>
    %28 = tpu.matmul %9, %27, %cst_12 {dimension_numbers = #tpu.dot_dimension_numbers<[1], [0], [0], [1], [0, 0, 1, 1], [], []>} : vector<16x36xbf16>, vector<36x128xbf16>, vector<16x128xf32> -> vector<16x128xf32>
    %c0_13 = arith.constant 0 : index
    %c0_14 = arith.constant 0 : index
    %29 = vector.load %arg5[%c0_13, %c0_14] : memref<4x128xbf16, #tpu.memory_space<vmem>>, vector<4x128xbf16>
    %cst_15 = arith.constant dense<0.000000e+00> : vector<16x128xf32>
    %30 = tpu.matmul %26, %29, %cst_15 {dimension_numbers = #tpu.dot_dimension_numbers<[1], [0], [0], [1], [0, 0, 1, 1], [], []>} : vector<16x4xbf16>, vector<4x128xbf16>, vector<16x128xf32> -> vector<16x128xf32>
    %31 = arith.addf %28, %30 : vector<16x128xf32>
    %32 = arith.mulf %31, %31 : vector<16x128xf32>
    %33 = arith.mulf %31, %32 : vector<16x128xf32>
    %cst_16 = arith.constant 4.471500e-02 : f32
    %34 = vector.broadcast %cst_16 : f32 to vector<16x128xf32>
    %35 = arith.mulf %34, %33 : vector<16x128xf32>
    %36 = arith.addf %31, %35 : vector<16x128xf32>
    %cst_17 = arith.constant 0.797884583 : f32
    %37 = vector.broadcast %cst_17 : f32 to vector<16x128xf32>
    %38 = arith.mulf %37, %36 : vector<16x128xf32>
    %39 = math.tanh %38 : vector<16x128xf32>
    %cst_18 = arith.constant 1.000000e+00 : f32
    %40 = vector.broadcast %cst_18 : f32 to vector<16x128xf32>
    %41 = arith.addf %40, %39 : vector<16x128xf32>
    %cst_19 = arith.constant 5.000000e-01 : f32
    %42 = vector.broadcast %cst_19 : f32 to vector<16x128xf32>
    %43 = arith.mulf %42, %41 : vector<16x128xf32>
    %44 = arith.mulf %31, %43 : vector<16x128xf32>
    %45 = arith.truncf %44 : vector<16x128xf32> to vector<16x128xbf16>
    %c0_20 = arith.constant 0 : index
    %c0_21 = arith.constant 0 : index
    %46 = vector.load %arg6[%c0_20, %c0_21] : memref<128x128xbf16, #tpu.memory_space<vmem>>, vector<128x128xbf16>
    %cst_22 = arith.constant dense<0.000000e+00> : vector<16x128xf32>
    %47 = tpu.matmul %45, %46, %cst_22 {dimension_numbers = #tpu.dot_dimension_numbers<[1], [0], [0], [1], [0, 0, 1, 1], [], []>} : vector<16x128xbf16>, vector<128x128xbf16>, vector<16x128xf32> -> vector<16x128xf32>
    %c0_23 = arith.constant 0 : index
    %c0_24 = arith.constant 0 : index
    %48 = vector.load %arg7[%c0_23, %c0_24] : memref<1x128xf32, #tpu.memory_space<vmem>>, vector<1x128xf32>
    %49 = vector.broadcast %48 : vector<1x128xf32> to vector<16x128xf32>
    %50 = arith.addf %47, %49 : vector<16x128xf32>
    %51 = arith.truncf %50 : vector<16x128xf32> to vector<16x128xbf16>
    %c0_25 = arith.constant 0 : index
    %c0_26 = arith.constant 0 : index
    %52 = vector.load %arg8[%c0_25, %c0_26] : memref<16x128xbf16, #tpu.memory_space<vmem>>, vector<16x128xbf16>
    tpu.vector_store %arg8[%c0_25, %c0_26], %51 {strides = array<i32>} : memref<16x128xbf16, #tpu.memory_space<vmem>>, vector<16x128xbf16>,
    return
  }
  func.func @transform_0(%arg0: i32) -> (i32, i32) {
    %c0_i32 = arith.constant 0 : i32
    %c0_i32_0 = arith.constant 0 : i32
    return %arg0, %c0_i32 : i32, i32
  }
  func.func @transform_1(%arg0: i32) -> (i32, i32) {
    %c0_i32 = arith.constant 0 : i32
    %c0_i32_0 = arith.constant 0 : i32
    %c0_i32_1 = arith.constant 0 : i32
    return %c0_i32, %c0_i32_0 : i32, i32
  }
  func.func @transform_2(%arg0: i32) -> (i32, i32) {
    %c0_i32 = arith.constant 0 : i32
    %c0_i32_0 = arith.constant 0 : i32
    %c0_i32_1 = arith.constant 0 : i32
    return %c0_i32, %c0_i32_0 : i32, i32
  }
  func.func @transform_3(%arg0: i32) -> (i32, i32) {
    %c0_i32 = arith.constant 0 : i32
    %c0_i32_0 = arith.constant 0 : i32
    %c0_i32_1 = arith.constant 0 : i32
    return %c0_i32, %c0_i32_0 : i32, i32
  }
  func.func @transform_4(%arg0: i32) -> (i32, i32) {
    %c0_i32 = arith.constant 0 : i32
    %c0_i32_0 = arith.constant 0 : i32
    %c0_i32_1 = arith.constant 0 : i32
    return %c0_i32, %c0_i32_0 : i32, i32
  }
  func.func @transform_5(%arg0: i32) -> (i32, i32) {
    %c0_i32 = arith.constant 0 : i32
    %c0_i32_0 = arith.constant 0 : i32
    %c0_i32_1 = arith.constant 0 : i32
    return %c0_i32, %c0_i32_0 : i32, i32
  }
  func.func @transform_6(%arg0: i32) -> (i32, i32) {
    %c0_i32 = arith.constant 0 : i32
    %c0_i32_0 = arith.constant 0 : i32
    %c0_i32_1 = arith.constant 0 : i32
    return %c0_i32, %c0_i32_0 : i32, i32
  }
  func.func @transform_7(%arg0: i32) -> (i32, i32) {
    %c0_i32 = arith.constant 0 : i32
    %c0_i32_0 = arith.constant 0 : i32
    return %arg0, %c0_i32 : i32, i32
  }
}

</mosaic_0001>

<bundles_post_ra>
// kernel: _forward_impl.1
= control target key start
LH: loop header
LB: loop body
LE: loop exit
PB: predicated region body
PF: predicated region fallthrough
CT: control target
= control target key end

     0   :  { %vm71_vm0 = vcmask 1041408   ;;  %v580_v0 = vmov 0.0   ;;  %vm581_vm1 = vmmov 0   ;;  %vm67_vm8 = vcmask 293888   ;;  %s716_s1 = inlined_call_operand.vmem [shape: bf16[36,12], index: 1, kind: input, shape index: {}]   ;;  %s717_s0 = inlined_call_operand.vmem [shape: bf16[16,36], index: 0, kind: input, shape index: {}]   ;;  %s718_s2 = inlined_call_operand.vmem [shape: bf16[12,4], index: 2, kind: input, shape index: {}]   ;;  %s719_s3 = inlined_call_operand.vmem [shape: bf16[36,128], index: 3, kind: input, shape index: {}]   ;;  %s720_s4 = inlined_call_operand.vmem [shape: bf16[4,128], index: 4, kind: input, shape index: {}]   ;;  %s721_s5 = inlined_call_operand.vmem [shape: bf16[128,128], index: 5, kind: input, shape index: {}]   ;;  %s722_s6 = inlined_call_operand.vmem [shape: f32[1,128], index: 6, kind: input, shape index: {}]   ;;  %s723_s7 = inlined_call_operand.vmem [shape: bf16[16,128], index: 7, kind: output, shape index: {}]  }
   0x1   :  { %507 = vmatprep.subr.bf16.mxu0 %v580_v0  ;;  %v561_v1 = vld [vmem:[%s716_s1 + $0x10] ss:$0 sps:$4 sm:$0x33]   ;;  %513 = vmatprep.mubr.msk.bf16.mxu0 %vm581_vm1, %v580_v0  ;;  %v478_v3 = vld [vmem:[%s717_s0] sm:$0xff]   ;;  %v562_v4 = vld [vmem:[%s716_s1 + $0x8] sm:$0xff]   ;;  %vm134_vm9 = vcmask 1045504  }
   0x2   :  { %523 = vmatprep.subr.bf16.mxu1 %v580_v0  ;;  %525 = vmatprep.mubr.msk.bf16.mxu1 %vm581_vm1, %v580_v0  ;;  %v73_v2 = vsel %vm71_vm0, %v561_v1, 0  ;;  %v479_v5 = vunpack.c.l.bf16 %v478_v3  ;;  %v480_v6 = vunpack.c.h.bf16 %v478_v3  ;;  %v563_v9 = vld [vmem:[%s716_s1] sm:$0xff]   ;;  %v565_v20 = vld [vmem:[%s719_s3 + $0x10] ss:$0 sps:$4 sm:$0x33]   ;;  %vm130_vm12 = vcmask 97280  }
   0x3   :  { %508 = vmatpush3.bf16.msra.mxu0 %v73_v2  ;;  %v564_v16 = vld [vmem:[%s718_s2] sm:$0x3f]   ;;  %v259_v26 = vsel %vm71_vm0, %v565_v20, 0  ;;  %v566_v27 = vld [vmem:[%s719_s3 + $0x8] sm:$0xff]   ;;  %vm192_vm15 = vcmask 31744   ;;  %v568_v42 = vld [vmem:[%s721_s5 + $0x38] sm:$0xff]  }
   0x4   :  { %509 = vmatprep.subr.bf16.mxu0 %v580_v0  ;;  %vm31_vm2 = vcmp.eq.f32.partialorder %v479_v5, %v479_v5  ;;  %v33_v7 = vand.u32 2147483647, %v479_v5  ;;  %v34_v8 = vand.u32 2147483647, %v480_v6  ;;  %vm32_vm3 = vcmp.eq.f32.partialorder %v480_v6, %v480_v6  ;;  %v567_v28 = vld [vmem:[%s719_s3] sm:$0xff]   ;;  %v569_v43 = vld [vmem:[%s721_s5 + $0x30] sm:$0xff]  }
   0x5   :  { %v136_v17 = vsel %vm134_vm9, %v564_v16, 0  ;;  %v191_v29 = vld [vmem:[%s720_s4] sm:$0x3]  ;;  %v570_v44 = vld [vmem:[%s721_s5 + $0x28] sm:$0xff]   ;;  %v572_v46 = vld [vmem:[%s721_s5 + $0x18] sm:$0xff]  }
   0x6   :  { %vm35_vm4 = vcmp.ne.f32.partialorder %v33_v7, inf  ;;  %vm36_vm5 = vcmp.ne.f32.partialorder %v34_v8, inf  ;;  %v197_v30 = vsel %vm71_vm0, %v191_v29, 0  ;;  %v571_v45 = vld [vmem:[%s721_s5 + $0x20] sm:$0xff]   ;;  %v573_v47 = vld [vmem:[%s721_s5 + $0x10] sm:$0xff]   ;;  %v574_v48 = vld [vmem:[%s721_s5 + $0x8] sm:$0xff]  }
   0x7   :  { %510 = vmatpush3.bf16.msra.mxu0 %v562_v4  ;;  %vm37_vm6 = vmand %vm31_vm2, %vm35_vm4  ;;  %524 = vmatpush3.bf16.msra.mxu1 %v197_v30  ;;  %v575_v49 = vld [vmem:[%s721_s5] sm:$0xff]  }
   0x8   :  { %511 = vmatprep.subr.bf16.mxu0 %v580_v0  ;;  %vm38_vm7 = vmand %vm32_vm3, %vm36_vm5  ;;  %v39_v10 = vsel %vm37_vm6, %v479_v5, 0.0  ;;  %v447_v11 = vsel %vm37_vm6, 1.0, %v580_v0  ;;  %539 = vmatprep.subr.bf16.mxu1 %v580_v0 }
   0x9   :  { %v40_v12 = vsel %vm38_vm7, %v480_v6, 0.0  ;;  %v448_v13 = vsel %vm38_vm7, 1.0, %v580_v0 }
   0xa   :  { %v41_v14 = vpack.c.bf16 %v40_v12, %v39_v10  ;;  %v46_v15 = vpack.c.bf16 %v448_v13, %v447_v11  ;;  %v464_v12 = vld [vmem:[%s722_s6] ss:$0 sm:$0xff] }
   0xb   :  { %512 = vmatpush3.bf16.msra.mxu0 %v563_v9 }
   0xc   :  { %517 = vmatprep.subr.bf16.mxu0 %v580_v0 }
   0xe   :  { %514 = vmatmul.mubr.msk.bf16.vlgmr.msra.gmra.mxu0 %vm67_vm8, %v46_v15 }
   0xf   :  { %519 = vmatprep.mubr.msk.bf16.mxu0 %vm581_vm1, %v580_v0  ;;  %518 = vmatpush3.bf16.msra.mxu0 %v136_v17 }
  0x10   :  { %529 = vmatprep.subr.bf16.mxu0 %v580_v0 }
  0xce   :  { %v109_v18 = vpop.f32.mrf.mxu0 }
  0xcf   :  { %vm116_vm10 = vcmp.gt.f32.partialorder %v109_v18, 2.5 }
  0xd0   :  { %v515_v19 = vpop.f32.mrf.mxu0  ;;  %v453_v22 = vsel %vm116_vm10, 1.0, %v580_v0 }
  0xd2   :  { %v112_v21 = vpop.f32.mrf.mxu0 }
  0xd3   :  { %vm117_vm11 = vcmp.gt.f32.partialorder %v112_v21, 2.5 }
  0xd4   :  { %v454_v23 = vsel %vm117_vm11, 1.0, %v580_v0  ;;  %v516_v24 = vpop.f32.mrf.mxu0 }
  0xd5   :  { %v122_v25 = vpack.c.bf16 %v454_v23, %v453_v22 }
  0xd7   :  { %520 = vmatmul.mubr.msk.bf16.vlgmr.msra.gmra.mxu0 %vm130_vm12, %v122_v25 }
  0xd8   :  { %530 = vmatpush3.bf16.msra.mxu0 %v259_v26  ;;  %535 = vmatprep.mubr.msk.bf16.mxu0 %vm581_vm1, %v580_v0 }
  0xd9   :  { %531 = vmatprep.subr.bf16.mxu0 %v580_v0 }
  0xdc   :  { %532 = vmatpush3.bf16.msra.mxu0 %v566_v27 }
  0xdd   :  { %533 = vmatprep.subr.bf16.mxu0 %v580_v0 }
  0xe0   :  { %534 = vmatpush3.bf16.msra.mxu0 %v567_v28 }
  0xe3   :  { %536 = vmatmul.mubr.msk.bf16.vlgmr.msra.gmra.mxu0 %vm67_vm8, %v41_v14 }
 0x197   :  { %v172_v31 = vpop.f32.mrf.mxu0 }
 0x198   :  { %vm179_vm13 = vcmp.gt.f32.partialorder %v172_v31, 0.5 }
 0x199   :  { %v521_v32 = vpop.f32.mrf.mxu0  ;;  %v457_v34 = vsel %vm179_vm13, 1.0, %v580_v0 }
 0x19b   :  { %v175_v33 = vpop.f32.mrf.mxu0 }
 0x19c   :  { %vm180_vm14 = vcmp.gt.f32.partialorder %v175_v33, 0.5 }
 0x19d   :  { %v458_v35 = vsel %vm180_vm14, 1.0, %v580_v0  ;;  %v522_v36 = vpop.f32.mrf.mxu0 }
 0x19e   :  { %v185_v37 = vpack.c.bf16 %v458_v35, %v457_v34 }
 0x1a0   :  { %526 = vmatmul.mubr.msk.bf16.vlgmr.msra.gmra.mxu1 %vm192_vm15, %v185_v37 }
 0x1a1   :  { %555 = vmatprep.mubr.msk.bf16.mxu1 %vm581_vm1, %v580_v0  ;;  %540 = vmatpush3.bf16.msra.mxu1 %v568_v42 }
 0x1a2   :  { %541 = vmatprep.subr.bf16.mxu1 %v580_v0 }
 0x1a3   :  { %v295_v38 = vpop.f32.mrf.mxu0 }
 0x1a5   :  { %v537_v39 = vpop.f32.mrf.mxu0  ;;  %542 = vmatpush3.bf16.msra.mxu1 %v569_v43 }
 0x1a6   :  { %543 = vmatprep.subr.bf16.mxu1 %v580_v0 }
 0x1a7   :  { %v298_v40 = vpop.f32.mrf.mxu0 }
 0x1a9   :  { %v538_v41 = vpop.f32.mrf.mxu0  ;;  %544 = vmatpush3.bf16.msra.mxu1 %v570_v44 }
 0x1aa   :  { %545 = vmatprep.subr.bf16.mxu1 %v580_v0 }
 0x1ad   :  { %546 = vmatpush3.bf16.msra.mxu1 %v571_v45 }
 0x1ae   :  { %547 = vmatprep.subr.bf16.mxu1 %v580_v0 }
 0x1b1   :  { %548 = vmatpush3.bf16.msra.mxu1 %v572_v46 }
 0x1b2   :  { %549 = vmatprep.subr.bf16.mxu1 %v580_v0 }
 0x1b5   :  { %550 = vmatpush3.bf16.msra.mxu1 %v573_v47 }
 0x1b6   :  { %551 = vmatprep.subr.bf16.mxu1 %v580_v0 }
 0x1b9   :  { %552 = vmatpush3.bf16.msra.mxu1 %v574_v48 }
 0x1ba   :  { %553 = vmatprep.subr.bf16.mxu1 %v580_v0 }
 0x1bd   :  { %554 = vmatpush3.bf16.msra.mxu1 %v575_v49 }
 0x260   :  { %v233_v50 = vpop.f32.mrf.mxu1 }
 0x261   :  { %v296_v51 = vadd.f32 %v295_v38, %v233_v50 }
 0x262   :  { %v527_v52 = vpop.f32.mrf.mxu1 }
 0x263   :  { %v302_v53 = vmul.f32 %v296_v51, %v296_v51 }
 0x264   :  { %v236_v54 = vpop.f32.mrf.mxu1 }
 0x265   :  { %v304_v55 = vmul.f32 %v302_v53, %v296_v51  ;;  %v299_v56 = vadd.f32 %v298_v40, %v236_v54 }
 0x266   :  { %v528_v57 = vpop.f32.mrf.mxu1 }
 0x267   :  { %v306_v58 = vmul.f32 0.044715, %v304_v55  ;;  %v303_v59 = vmul.f32 %v299_v56, %v299_v56 }
 0x269   :  { %v308_v60 = vadd.f32 %v306_v58, %v296_v51  ;;  %v305_v61 = vmul.f32 %v303_v59, %v299_v56 }
 0x26b   :  { %v310_v62 = vmul.f32 0.7978846, %v308_v60  ;;  %v307_v63 = vmul.f32 0.044715, %v305_v61 }
 0x26d   :  { %576 = vtanh.f32 %v310_v62  ;;  %v309_v0 = vadd.f32 %v307_v63, %v299_v56 }
 0x26f   :  { %v311_v1 = vmul.f32 0.7978846, %v309_v0 }
 0x271   :  { %578 = vtanh.f32 %v311_v1 }
 0x27a   :  { %v577_v2 = vpop.eup %576 }
 0x27b   :  { %v314_v3 = vadd.f32 1.0, %v577_v2 }
 0x27d   :  { %v316_v5 = vmul.f32 0.5, %v314_v3 }
 0x27e   :  { %v579_v4 = vpop.eup %578 }
 0x27f   :  { %v315_v6 = vadd.f32 1.0, %v579_v4  ;;  %v318_v8 = vmul.f32 %v316_v5, %v296_v51 }
 0x281   :  { %v317_v7 = vmul.f32 0.5, %v315_v6 }
 0x283   :  { %v319_v9 = vmul.f32 %v317_v7, %v299_v56 }
 0x285   :  { %v320_v10 = vpack.c.bf16 %v319_v9, %v318_v8 }
 0x287   :  { %556 = vmatmul.mubr.bf16.vlgmr.msra.gmra.mxu1 %v320_v10 }
 0x347   :  { %v426_v11 = vpop.f32.mrf.mxu1 }
 0x348   :  { %v427_v15 = vadd.f32 %v464_v12, %v426_v11 }
 0x349   :  { %v557_v13 = vpop.f32.mrf.mxu1 }
 0x34b   :  { %v429_v14 = vpop.f32.mrf.mxu1 }
 0x34c   :  { %v430_v16 = vadd.f32 %v464_v12, %v429_v14 }
 0x34d   :  { %v558_v17 = vpop.f32.mrf.mxu1 }
 0x34e   :  { %v484_v18 = vpack.c.bf16 %v430_v16, %v427_v15 }
 0x350   :  { %485 = vst [vmem:[%s723_s7] sm:$0xff] %v484_v18  }

</bundles_post_ra>
